<compile_context>
chip_gen: v6e
topology: v6e:2x2x1
jax: 0.10.0
libtpu: 0.0.40
codegen_flags: <defaults>
</compile_context>

<pallas_src>
import jax
import jax.numpy as jnp
from jax.experimental import pallas as pl
from jax.experimental.pallas import tpu as pltpu


_LANE_CANDIDATES = (1024, 512, 256, 128)
_BLOCK_ROW_CANDIDATES = (2048, 1024, 512, 256, 128, 64, 32, 16, 8)


def _elu_plus_one_kernel(x_ref, o_ref):
    # phi(x) = elu(x) + 1 == max(x, 0) + exp(min(x, 0))
    #   x > 0  -> x + exp(0) = x + 1
    #   x <= 0 -> 0 + exp(x) = exp(x)
    # max/min/add run on the VPU; exp runs on the EUP (its own VLIW slot).
    x = x_ref[...]
    if not jnp.issubdtype(x.dtype, jnp.floating):
        x = x.astype(jnp.float32)
    y = jnp.maximum(x, 0.0) + jnp.exp(jnp.minimum(x, 0.0))
    o_ref[...] = y.astype(o_ref.dtype)


def _choose_block_rows(rows, lane, itemsize, target_bytes=4 << 20):
    """Largest ~4 MiB block whose row count divides `rows` exactly."""
    # Native sublane tiling: 8 for 4-byte dtypes, 16 for 2-byte, 32 for 1-byte.
    min_sub = {4: 8, 2: 16, 1: 32}.get(itemsize, 8)
    budget_rows = max(min_sub, target_bytes // (lane * itemsize))
    for cand in _BLOCK_ROW_CANDIDATES:
        if cand < min_sub:
            continue
        if cand <= budget_rows and cand < rows and rows % cand == 0:
            return cand
    if rows <= budget_rows:
        return rows  # full (small) array in a single block
    # Ragged fallback: Pallas masks out-of-bounds reads/writes of the tail block.
    return max(min_sub, (budget_rows // min_sub) * min_sub)


def activation_feature_map(x):
    """Apply phi(x) = elu(x) + 1 element-wise via a Pallas TPU kernel.

    x: array of any shape.  Returns an array of the same shape/dtype.
    """
    orig_shape = x.shape
    total = x.size
    if total == 0:
        return x
    itemsize = jnp.dtype(x.dtype).itemsize

    # Lane-dense re-factorization of the flattened element count.
    lane = next((l for l in _LANE_CANDIDATES if total % l == 0), None)
    pad = 0
    if lane is None:
        # Rare fallback: total not a multiple of 128 -> pad the flat vector once.
        lane = 128
        pad = (-total) % lane
    rows = (total + pad) // lane

    x_flat = x.reshape(-1)
    if pad:
        x_flat = jnp.pad(x_flat, (0, pad))
    x2 = x_flat.reshape(rows, lane)

    block_rows = _choose_block_rows(rows, lane, itemsize)
    grid = (pl.cdiv(rows, block_rows),)

    out = pl.pallas_call(
        _elu_plus_one_kernel,
        out_shape=jax.ShapeDtypeStruct((rows, lane), x.dtype),
        grid_spec=pltpu.PrefetchScalarGridSpec(
            num_scalar_prefetch=0,
            grid=grid,
            in_specs=[pl.BlockSpec((block_rows, lane), lambda i: (i, 0))],
            out_specs=pl.BlockSpec((block_rows, lane), lambda i: (i, 0)),
        ),
        compiler_params=pltpu.CompilerParams(
            dimension_semantics=("parallel",),  # shards the grid across TCs on v7x
        ),
    )(x2)

    out_flat = out.reshape(-1)
    if pad:
        out_flat = out_flat[:total]
    return out_flat.reshape(orig_shape)
    # TODO(synk): for linear attention, fuse phi(x) into the consuming Pallas
    # matmul's LHS load (or leave to XLA fusion) to avoid the extra HBM round trip.


class FeatureMap:
    """JAX equivalent of the PyTorch FeatureMap interface."""

    def __init__(self, query_dims):
        self.query_dims = query_dims

    def new_feature_map(self, device=None, dtype=None):
        raise NotImplementedError()

    def forward_queries(self, x):
        return self(x)

    def forward_keys(self, x):
        return self(x)

    def __call__(self, x):
        raise NotImplementedError()

    @classmethod
    def factory(cls, *args, **kwargs):
        def inner(query_dims):
            return cls(query_dims, *args, **kwargs)
        return inner


class ActivationFunctionFeatureMap(FeatureMap):
    """A feature map that is simply an element-wise activation function."""

    def __init__(self, query_dims, activation_function):
        super().__init__(query_dims)
        self.activation_function = activation_function

    def new_feature_map(self, device=None, dtype=None):
        return  # no parameters

    def __call__(self, x):
        return self.activation_function(x)


# The standard elu feature map used by linear attention.
elu_feature_map = ActivationFunctionFeatureMap.factory(activation_feature_map)


if __name__ == "__main__":
    key = jax.random.PRNGKey(0)

    # (batch=2, seq=8, heads=4, head_dim=32) -> lane-dense (2, 1024) slab.
    N, L, H, E = 2, 8, 4, 32
    x = jax.random.normal(key, (N, L, H, E), dtype=jnp.float32)

    fmap = elu_feature_map(query_dims=E)
    fmap.new_feature_map(None, jnp.float32)

    out = jax.block_until_ready(fmap.forward_queries(x))
    ref = jax.nn.elu(x) + 1.0
    assert out.shape == x.shape and out.dtype == x.dtype
    assert jnp.allclose(out, ref, atol=1e-5, rtol=1e-5)

    # Multi-block case (rows=16, block_rows=8 -> 2 parallel grid steps).
    x2 = jax.random.normal(jax.random.PRNGKey(1), (2, 64, 4, 32), jnp.float32)
    out2 = jax.block_until_ready(activation_feature_map(x2))
    assert jnp.allclose(out2, jax.nn.elu(x2) + 1.0, atol=1e-5, rtol=1e-5)

    # Ragged total (960 elements, not a multiple of 128) -> pad fallback path.
    x3 = jax.random.normal(jax.random.PRNGKey(2), (3, 5, 2, 32), jnp.float32)
    out3 = jax.block_until_ready(activation_feature_map(x3))
    assert jnp.allclose(out3, jax.nn.elu(x3) + 1.0, atol=1e-5, rtol=1e-5)

    # bf16 path (computed natively in bf16, no f32 upcast).
    xb = x.astype(jnp.bfloat16)
    outb = jax.block_until_ready(activation_feature_map(xb))
    refb = (jax.nn.elu(xb.astype(jnp.float32)) + 1.0)
    assert outb.dtype == jnp.bfloat16
    assert jnp.allclose(outb.astype(jnp.float32), refb, atol=3e-2, rtol=3e-2)

    print("KERNEL_OK")
</pallas_src>

<mosaic_0001>
module attributes {stable_mosaic.version = 11 : i64} {
  func.func @_elu_plus_one_kernel(%arg0: i32, %arg1: memref<2x1024xf32, #tpu.memory_space<vmem>>, %arg2: memref<2x1024xf32, #tpu.memory_space<vmem>>) attributes {dimension_semantics = [#tpu.dimension_semantics<parallel>], iteration_bounds = array<i64: 1>, scalar_prefetch = 0 : i64, scratch_operands = 0 : i64, tpu.core_type = #tpu.core_type<tc>, window_params = [{transform_indices = @transform_0, window_bounds = array<i64: 2, 1024>}, {transform_indices = @transform_1, window_bounds = array<i64: 2, 1024>}]} {
    %c0 = arith.constant 0 : index
    %c0_0 = arith.constant 0 : index
    %0 = vector.load %arg1[%c0, %c0_0] : memref<2x1024xf32, #tpu.memory_space<vmem>>, vector<2x1024xf32>
    %cst = arith.constant 0.000000e+00 : f32
    %1 = vector.broadcast %cst : f32 to vector<2x1024xf32>
    %2 = arith.maximumf %0, %1 : vector<2x1024xf32>
    %cst_1 = arith.constant 0.000000e+00 : f32
    %3 = vector.broadcast %cst_1 : f32 to vector<2x1024xf32>
    %4 = arith.minimumf %0, %3 : vector<2x1024xf32>
    %5 = math.exp %4 : vector<2x1024xf32>
    %6 = arith.addf %2, %5 : vector<2x1024xf32>
    %c0_2 = arith.constant 0 : index
    %c0_3 = arith.constant 0 : index
    %7 = vector.load %arg2[%c0_2, %c0_3] : memref<2x1024xf32, #tpu.memory_space<vmem>>, vector<2x1024xf32>
    tpu.vector_store %arg2[%c0_2, %c0_3], %6 {strides = array<i32>} : memref<2x1024xf32, #tpu.memory_space<vmem>>, vector<2x1024xf32>,
    return
  }
  func.func @transform_0(%arg0: i32) -> (i32, i32) {
    %c0_i32 = arith.constant 0 : i32
    %c0_i32_0 = arith.constant 0 : i32
    return %arg0, %c0_i32 : i32, i32
  }
  func.func @transform_1(%arg0: i32) -> (i32, i32) {
    %c0_i32 = arith.constant 0 : i32
    %c0_i32_0 = arith.constant 0 : i32
    return %arg0, %c0_i32 : i32, i32
  }
}

</mosaic_0001>

<bundles_post_ra>
// kernel: tpu_custom_call.1
= control target key start
LH: loop header
LB: loop body
LE: loop exit
PB: predicated region body
PF: predicated region fallthrough
CT: control target
= control target key end

     0   :  { %6 = vsyncpa [#allocation3], 0  ;;  %s118_s0 = inlined_call_operand.hbm [shape: f32[2,1024], index: 0, kind: input, shape index: {}]   ;;  %s119_s1 = inlined_call_operand.hbm [shape: f32[2,1024], index: 1, kind: output, shape index: {}]  }
   0x1   :  { %7 = vsyncpa [#allocation4], 0  ;;  %s100_s6 = smov [#allocation2]  }
   0x2   :  { %s14_s7 = sshll.u32 %s100_s6, 4  ;;  %s15_s7 = int_to_ptr.vmem [resolvable:$true] %s14_s7 }
   0x3   :  { %s64_s8 = scalar_lea.vmem %s15_s7, 256  ;;  %p69_p1 = scmp.lt.s32.totalorder %s15_s7, %s15_s7 }
   0x4   :  { %p65_p0 = scmp.ne.s32.totalorder %s15_s7, %s64_s8  ;;  %p70_p2 = scmp.lt.s32.totalorder %s64_s8, %s64_s8 }
   0x6   :  { %p71_p3 = por %p70_p2, %p69_p1 }
   0x8   :  { %p72_p4 = pnand %p71_p3, %p65_p0 }
   0xa   :  { %75 = shalt.err (!%p72_p4)
}
   0xb   :  { %17 = dma.hbm_to_vmem [thread:$0]  %s118_s0, 256, %s15_s7, [#allocation3]  }
   0xc   :  { %96 = dma.done.wait [#allocation3], 256  }
   0xd   :  { %97 = vsyncadd [#allocation3], 4294967040  ;;  %v21_v0 = vld [vmem:[#allocation2] sm:$0xff]  ;;  %v22_v1 = vld [vmem:[#allocation2 + $0x8] sm:$0xff]  ;;  %s101_s11 = smov [#allocation5]  }
   0xe   :  { %v25_v2 = vmin.f32 %v21_v0, 0.0  ;;  %v26_v3 = vmin.f32 %v22_v1, 0.0  ;;  %v23_v6 = vmax.f32 %v21_v0, 0.0  ;;  %v24_v7 = vmax.f32 %v22_v1, 0.0  ;;  %s41_s12 = sshll.u32 %s101_s11, 4  ;;  %s42_s12 = int_to_ptr.vmem [resolvable:$true] %s41_s12 }
   0xf   :  { %s76_s0 = scalar_lea.vmem %s42_s12, 256  ;;  %p81_p6 = scmp.lt.s32.totalorder %s42_s12, %s42_s12 }
  0x10   :  { %v27_v4 = vmul.f32 1.442695, %v25_v2  ;;  %v29_v5 = vmul.f32 1.442695, %v26_v3  ;;  %p77_p5 = scmp.ne.s32.totalorder %s42_s12, %s76_s0  ;;  %p82_p7 = scmp.lt.s32.totalorder %s76_s0, %s76_s0 }
  0x12   :  { %52 = vpow2.f32 %v27_v4  ;;  %p83_p8 = por %p82_p7, %p81_p6 }
  0x13   :  { %54 = vpow2.f32 %v29_v5 }
  0x14   :  { %p84_p9 = pnand %p83_p8, %p77_p5 }
  0x1f   :  { %v53_v8 = vpop.eup %52 }
  0x20   :  { %v55_v9 = vpop.eup %54  ;;  %v31_v10 = vadd.f32 %v53_v8, %v23_v6 }
  0x21   :  { %v32_v11 = vadd.f32 %v55_v9, %v24_v7 }
  0x22   :  { %33 = vst [vmem:[#allocation5] sm:$0xff] %v31_v10 }
  0x23   :  { %34 = vst [vmem:[#allocation5 + $0x8] sm:$0xff] %v32_v11 }
  0x24   :  { %87 = shalt.err (!%p84_p9)
}
  0x25   :  { %44 = dma.vmem_to_hbm [thread:$0]  %s42_s12, 256, %s119_s1, [#allocation4]  }
  0x26   :  { %98 = dma.done.wait [#allocation4], 256  }
  0x27   :  { %99 = vsyncadd [#allocation4], 4294967040 }
  0x28   :  { %48 = vsyncpa [#allocation3], 1 }
  0x29   :  { %49 = vsyncpa [#allocation4], 1 }

</bundles_post_ra>
